<compile_context>
chip_gen: v6e
topology: v6e:2x2x1
jax: 0.10.0
libtpu: 0.0.40
codegen_flags: <defaults>
</compile_context>

<pallas_src>
import jax
import jax.numpy as jnp
from jax.experimental import pallas as pl
from jax.experimental.pallas import tpu as pltpu

# Per-channel normalization from the PyTorch module: (x + off) / scale.
# The +off cancels in every difference, so only 1/scale**2 survives.
_SCALES = (4.37, 4.46, 4.44)
_INV_SCALE_SQ = tuple(1.0 / (s * s) for s in _SCALES)


def _tv_loss_kernel(img_ref, halo_ref, out_ref):
    """One H-band of the image.

    img_ref : (3, TILE_H, W)  current row band, original dtype
    halo_ref: (3, HB, W)      first rows of the *next* band (only row 0 is used)
    out_ref : (1, 8, 128)     tile-aligned slab holding this band's partial sum
    """
    tile_h = img_ref.shape[1]

    # The cross-band boundary difference only exists for non-final bands; for
    # the final band the reference's edge replication makes it exactly zero.
    keep_boundary = jnp.where(pl.program_id(0) < pl.num_programs(0) - 1,
                              jnp.float32(1.0), jnp.float32(0.0))

    total = jnp.float32(0.0)
    for c in range(3):  # static unroll over the 3 channels
        t = img_ref[c].astype(jnp.float32)                 # cast per tile, in-kernel
        dh = t[1:, :] - t[:-1, :]                          # H-diffs inside the band
        dw = t[:, 1:] - t[:, :-1]                          # W-diffs (last col of gy is 0)
        nxt = halo_ref[c][0:1, :].astype(jnp.float32)      # first row of next band
        bh = (nxt - t[tile_h - 1:tile_h, :]) * keep_boundary
        csum = jnp.sum(dh * dh) + jnp.sum(dw * dw) + jnp.sum(bh * bh)
        total = total + csum * _INV_SCALE_SQ[c]            # fold 1/scale**2 here

    out_ref[...] = jnp.broadcast_to(total, (1, 8, 128))


def _pick_tile_h(h, w):
    """Largest H-band (multiple of 8, dividing H) whose f32 working set stays a
    few MiB, so double-buffered inputs + elementwise temporaries fit the default
    scoped VMEM on v5e (16 MiB) / v6e (32 MiB) / v7x (32 of 64 MiB)."""
    budget = 4 * 1024 * 1024  # f32 bytes for one (3, TILE_H, W) band
    for tm in (512, 256, 128, 64, 32, 16, 8):
        if tm <= h and h % tm == 0 and 3 * tm * w * 4 <= budget:
            return tm
    # TODO(synk): H with no multiple-of-8 divisor falls back to one whole-image band.
    return h


def tv_loss_pallas(x, *, tile_h=None):
    """TVLoss forward: x is NCHW with N == 1, C == 3.

    Returns (x, loss): the PyTorch module returns its input unchanged and keeps
    the scalar TV loss as a side value (self.loss)."""
    assert x.ndim == 4 and x.shape[0] == 1 and x.shape[1] == 3, "expects (1, 3, H, W)"
    _, _, H, W = x.shape
    assert H >= 2 and W >= 2

    TM = _pick_tile_h(H, W) if tile_h is None else int(tile_h)
    assert H % TM == 0 and (TM == H or TM % 8 == 0), \
        "tile_h must divide H and be a multiple of 8 (or equal H)"
    G = H // TM
    HB = 8 if TM % 8 == 0 else TM  # halo band height (only its first row is used)

    # Current band: rows [i*TM, (i+1)*TM).  Halo: rows starting at (i+1)*TM,
    # clamped for the final band (whose boundary term is masked in-kernel).
    img_spec = pl.BlockSpec((None, 3, TM, W), lambda i: (0, 0, i, 0))
    halo_spec = pl.BlockSpec(
        (None, 3, HB, W),
        lambda i: (0, 0, jnp.minimum(i + 1, G - 1) * (TM // HB), 0))
    out_spec = pl.BlockSpec((1, 8, 128), lambda i: (i, 0, 0))

    partials = pl.pallas_call(
        _tv_loss_kernel,
        out_shape=jax.ShapeDtypeStruct((G, 8, 128), jnp.float32),
        grid=(G,),
        in_specs=[img_spec, halo_spec],
        out_specs=out_spec,
        compiler_params=pltpu.CompilerParams(
            # One independent partial sum per band -> the band axis is truly
            # parallel (both v7x TensorCores can stream separate bands).
            dimension_semantics=("parallel",),
            vmem_limit_bytes=32 * 1024 * 1024,
        ),
    )(x, x)

    loss = jnp.sum(partials[:, 0, 0]) / jnp.float32(H * W * 3)
    return x, loss


def _tv_loss_ref(x):
    """Pure-JAX reference mirroring the torch code exactly (f32 math)."""
    image = jnp.transpose(x[0], (1, 2, 0)).astype(jnp.float32)  # (H, W, 3)
    r = (image[:, :, 0] + 2.12) / 4.37
    g = (image[:, :, 1] + 2.04) / 4.46
    b = (image[:, :, 2] + 1.8) / 4.44
    temp = jnp.stack([r, g, b], axis=2)
    gx = jnp.concatenate([temp[1:, :, :], temp[-1:, :, :]], axis=0) - temp
    gy = jnp.concatenate([temp[:, 1:, :], temp[:, -1:, :]], axis=1) - temp
    return jnp.mean(gx ** 2) + jnp.mean(gy ** 2)


if __name__ == "__main__":
    k1, k2, k3 = jax.random.split(jax.random.PRNGKey(0), 3)

    # Case 1: multi-band grid (4 bands of 32 rows) -> exercises halo + partial sums.
    x1 = jax.random.normal(k1, (1, 3, 128, 128), dtype=jnp.float32)
    out1, loss1 = jax.jit(lambda v: tv_loss_pallas(v, tile_h=32))(x1)
    jax.block_until_ready((out1, loss1))
    ref1 = _tv_loss_ref(x1)
    assert jnp.allclose(out1, x1), "forward pass must return the input unchanged"
    assert jnp.allclose(loss1, ref1, rtol=1e-4, atol=1e-7), (loss1, ref1)

    # Case 2: tiny image, auto tile selection (single band) -- original test shape.
    x2 = jax.random.normal(k2, (1, 3, 16, 16), dtype=jnp.float32)
    out2, loss2 = jax.jit(tv_loss_pallas)(x2)
    jax.block_until_ready((out2, loss2))
    ref2 = _tv_loss_ref(x2)
    assert jnp.allclose(out2, x2)
    assert jnp.allclose(loss2, ref2, rtol=1e-4, atol=1e-7), (loss2, ref2)

    # Case 3: bf16 input -- the dtype cast happens per-tile inside the kernel.
    x3 = jax.random.normal(k3, (1, 3, 64, 128), dtype=jnp.float32).astype(jnp.bfloat16)
    out3, loss3 = jax.jit(lambda v: tv_loss_pallas(v, tile_h=16))(x3)
    jax.block_until_ready((out3, loss3))
    ref3 = _tv_loss_ref(x3)
    assert jnp.allclose(out3, x3)
    assert jnp.allclose(loss3, ref3, rtol=1e-4, atol=1e-7), (loss3, ref3)

    print("KERNEL_OK")
</pallas_src>

<mosaic_0001>
module attributes {stable_mosaic.version = 11 : i64} {
  func.func @_tv_loss_kernel(%arg0: i32, %arg1: memref<1x3x32x128xf32, #tpu.memory_space<vmem>>, %arg2: memref<1x3x8x128xf32, #tpu.memory_space<vmem>>, %arg3: memref<1x8x128xf32, #tpu.memory_space<vmem>>) attributes {dimension_semantics = [#tpu.dimension_semantics<parallel>], iteration_bounds = array<i64: 4>, scalar_prefetch = 0 : i64, scratch_operands = 0 : i64, tpu.core_type = #tpu.core_type<tc>, window_params = [{transform_indices = @transform_0, window_bounds = array<i64: 1, 3, 32, 128>}, {transform_indices = @transform_1, window_bounds = array<i64: 1, 3, 8, 128>}, {transform_indices = @transform_2, window_bounds = array<i64: 1, 8, 128>}]} {
    %c3_i32 = arith.constant 3 : i32
    %0 = arith.cmpi slt, %arg0, %c3_i32 : i32
    %cst = arith.constant 1.000000e+00 : f32
    %cst_0 = arith.constant 0.000000e+00 : f32
    %1 = arith.select %0, %cst, %cst_0 : f32
    %c0 = arith.constant 0 : index
    %c0_1 = arith.constant 0 : index
    %c0_2 = arith.constant 0 : index
    %c0_3 = arith.constant 0 : index
    %2 = vector.load %arg1[%c0, %c0_1, %c0_2, %c0_3] : memref<1x3x32x128xf32, #tpu.memory_space<vmem>>, vector<1x1x32x128xf32>
    %3 = vector.shape_cast %2 : vector<1x1x32x128xf32> to vector<32x128xf32>
    %4 = vector.extract_strided_slice %3 {offsets = [1, 0], sizes = [31, 128], strides = [1, 1]} : vector<32x128xf32> to vector<31x128xf32>
    %5 = vector.extract_strided_slice %3 {offsets = [0, 0], sizes = [31, 128], strides = [1, 1]} : vector<32x128xf32> to vector<31x128xf32>
    %6 = arith.subf %4, %5 : vector<31x128xf32>
    %7 = vector.extract_strided_slice %3 {offsets = [0, 1], sizes = [32, 127], strides = [1, 1]} : vector<32x128xf32> to vector<32x127xf32>
    %8 = vector.extract_strided_slice %3 {offsets = [0, 0], sizes = [32, 127], strides = [1, 1]} : vector<32x128xf32> to vector<32x127xf32>
    %9 = arith.subf %7, %8 : vector<32x127xf32>
    %c0_4 = arith.constant 0 : index
    %c0_5 = arith.constant 0 : index
    %c0_6 = arith.constant 0 : index
    %c0_7 = arith.constant 0 : index
    %10 = vector.load %arg2[%c0_4, %c0_5, %c0_6, %c0_7] : memref<1x3x8x128xf32, #tpu.memory_space<vmem>>, vector<1x1x8x128xf32>
    %11 = vector.shape_cast %10 : vector<1x1x8x128xf32> to vector<8x128xf32>
    %12 = vector.extract_strided_slice %11 {offsets = [0, 0], sizes = [1, 128], strides = [1, 1]} : vector<8x128xf32> to vector<1x128xf32>
    %13 = vector.extract_strided_slice %3 {offsets = [31, 0], sizes = [1, 128], strides = [1, 1]} : vector<32x128xf32> to vector<1x128xf32>
    %14 = arith.subf %12, %13 : vector<1x128xf32>
    %15 = vector.broadcast %1 : f32 to vector<1x128xf32>
    %16 = arith.mulf %14, %15 : vector<1x128xf32>
    %17 = arith.mulf %6, %6 : vector<31x128xf32>
    %18 = vector.shape_cast %17 : vector<31x128xf32> to vector<1x31x128xf32>
    %cst_8 = arith.constant dense<0.000000e+00> : vector<1xf32>
    %19 = vector.multi_reduction <add>, %18, %cst_8 [1, 2] : vector<1x31x128xf32> to vector<1xf32>
    %20 = vector.shape_cast %19 : vector<1xf32> to vector<1x1x1xf32>
    %21 = vector.extract %20[0, 0, 0] : f32 from vector<1x1x1xf32>
    %22 = arith.mulf %9, %9 : vector<32x127xf32>
    %23 = vector.shape_cast %22 : vector<32x127xf32> to vector<1x32x127xf32>
    %cst_9 = arith.constant dense<0.000000e+00> : vector<1xf32>
    %24 = vector.multi_reduction <add>, %23, %cst_9 [1, 2] : vector<1x32x127xf32> to vector<1xf32>
    %25 = vector.shape_cast %24 : vector<1xf32> to vector<1x1x1xf32>
    %26 = vector.extract %25[0, 0, 0] : f32 from vector<1x1x1xf32>
    %27 = arith.addf %21, %26 : f32
    %28 = arith.mulf %16, %16 : vector<1x128xf32>
    %29 = vector.shape_cast %28 : vector<1x128xf32> to vector<1x1x128xf32>
    %cst_10 = arith.constant dense<0.000000e+00> : vector<1xf32>
    %30 = vector.multi_reduction <add>, %29, %cst_10 [1, 2] : vector<1x1x128xf32> to vector<1xf32>
    %31 = vector.shape_cast %30 : vector<1xf32> to vector<1x1x1xf32>
    %32 = vector.extract %31[0, 0, 0] : f32 from vector<1x1x1xf32>
    %33 = arith.addf %27, %32 : f32
    %cst_11 = arith.constant 0.0523645207 : f32
    %34 = arith.mulf %33, %cst_11 : f32
    %cst_12 = arith.constant 0.000000e+00 : f32
    %35 = arith.addf %cst_12, %34 : f32
    %c0_13 = arith.constant 0 : index
    %c1 = arith.constant 1 : index
    %c0_14 = arith.constant 0 : index
    %c0_15 = arith.constant 0 : index
    %36 = vector.load %arg1[%c0_13, %c1, %c0_14, %c0_15] : memref<1x3x32x128xf32, #tpu.memory_space<vmem>>, vector<1x1x32x128xf32>
    %37 = vector.shape_cast %36 : vector<1x1x32x128xf32> to vector<32x128xf32>
    %38 = vector.extract_strided_slice %37 {offsets = [1, 0], sizes = [31, 128], strides = [1, 1]} : vector<32x128xf32> to vector<31x128xf32>
    %39 = vector.extract_strided_slice %37 {offsets = [0, 0], sizes = [31, 128], strides = [1, 1]} : vector<32x128xf32> to vector<31x128xf32>
    %40 = arith.subf %38, %39 : vector<31x128xf32>
    %41 = vector.extract_strided_slice %37 {offsets = [0, 1], sizes = [32, 127], strides = [1, 1]} : vector<32x128xf32> to vector<32x127xf32>
    %42 = vector.extract_strided_slice %37 {offsets = [0, 0], sizes = [32, 127], strides = [1, 1]} : vector<32x128xf32> to vector<32x127xf32>
    %43 = arith.subf %41, %42 : vector<32x127xf32>
    %c0_16 = arith.constant 0 : index
    %c1_17 = arith.constant 1 : index
    %c0_18 = arith.constant 0 : index
    %c0_19 = arith.constant 0 : index
    %44 = vector.load %arg2[%c0_16, %c1_17, %c0_18, %c0_19] : memref<1x3x8x128xf32, #tpu.memory_space<vmem>>, vector<1x1x8x128xf32>
    %45 = vector.shape_cast %44 : vector<1x1x8x128xf32> to vector<8x128xf32>
    %46 = vector.extract_strided_slice %45 {offsets = [0, 0], sizes = [1, 128], strides = [1, 1]} : vector<8x128xf32> to vector<1x128xf32>
    %47 = vector.extract_strided_slice %37 {offsets = [31, 0], sizes = [1, 128], strides = [1, 1]} : vector<32x128xf32> to vector<1x128xf32>
    %48 = arith.subf %46, %47 : vector<1x128xf32>
    %49 = vector.broadcast %1 : f32 to vector<1x128xf32>
    %50 = arith.mulf %48, %49 : vector<1x128xf32>
    %51 = arith.mulf %40, %40 : vector<31x128xf32>
    %52 = vector.shape_cast %51 : vector<31x128xf32> to vector<1x31x128xf32>
    %cst_20 = arith.constant dense<0.000000e+00> : vector<1xf32>
    %53 = vector.multi_reduction <add>, %52, %cst_20 [1, 2] : vector<1x31x128xf32> to vector<1xf32>
    %54 = vector.shape_cast %53 : vector<1xf32> to vector<1x1x1xf32>
    %55 = vector.extract %54[0, 0, 0] : f32 from vector<1x1x1xf32>
    %56 = arith.mulf %43, %43 : vector<32x127xf32>
    %57 = vector.shape_cast %56 : vector<32x127xf32> to vector<1x32x127xf32>
    %cst_21 = arith.constant dense<0.000000e+00> : vector<1xf32>
    %58 = vector.multi_reduction <add>, %57, %cst_21 [1, 2] : vector<1x32x127xf32> to vector<1xf32>
    %59 = vector.shape_cast %58 : vector<1xf32> to vector<1x1x1xf32>
    %60 = vector.extract %59[0, 0, 0] : f32 from vector<1x1x1xf32>
    %61 = arith.addf %55, %60 : f32
    %62 = arith.mulf %50, %50 : vector<1x128xf32>
    %63 = vector.shape_cast %62 : vector<1x128xf32> to vector<1x1x128xf32>
    %cst_22 = arith.constant dense<0.000000e+00> : vector<1xf32>
    %64 = vector.multi_reduction <add>, %63, %cst_22 [1, 2] : vector<1x1x128xf32> to vector<1xf32>
    %65 = vector.shape_cast %64 : vector<1xf32> to vector<1x1x1xf32>
    %66 = vector.extract %65[0, 0, 0] : f32 from vector<1x1x1xf32>
    %67 = arith.addf %61, %66 : f32
    %cst_23 = arith.constant 0.0502724759 : f32
    %68 = arith.mulf %67, %cst_23 : f32
    %69 = arith.addf %35, %68 : f32
    %c0_24 = arith.constant 0 : index
    %c2 = arith.constant 2 : index
    %c0_25 = arith.constant 0 : index
    %c0_26 = arith.constant 0 : index
    %70 = vector.load %arg1[%c0_24, %c2, %c0_25, %c0_26] : memref<1x3x32x128xf32, #tpu.memory_space<vmem>>, vector<1x1x32x128xf32>
    %71 = vector.shape_cast %70 : vector<1x1x32x128xf32> to vector<32x128xf32>
    %72 = vector.extract_strided_slice %71 {offsets = [1, 0], sizes = [31, 128], strides = [1, 1]} : vector<32x128xf32> to vector<31x128xf32>
    %73 = vector.extract_strided_slice %71 {offsets = [0, 0], sizes = [31, 128], strides = [1, 1]} : vector<32x128xf32> to vector<31x128xf32>
    %74 = arith.subf %72, %73 : vector<31x128xf32>
    %75 = vector.extract_strided_slice %71 {offsets = [0, 1], sizes = [32, 127], strides = [1, 1]} : vector<32x128xf32> to vector<32x127xf32>
    %76 = vector.extract_strided_slice %71 {offsets = [0, 0], sizes = [32, 127], strides = [1, 1]} : vector<32x128xf32> to vector<32x127xf32>
    %77 = arith.subf %75, %76 : vector<32x127xf32>
    %c0_27 = arith.constant 0 : index
    %c2_28 = arith.constant 2 : index
    %c0_29 = arith.constant 0 : index
    %c0_30 = arith.constant 0 : index
    %78 = vector.load %arg2[%c0_27, %c2_28, %c0_29, %c0_30] : memref<1x3x8x128xf32, #tpu.memory_space<vmem>>, vector<1x1x8x128xf32>
    %79 = vector.shape_cast %78 : vector<1x1x8x128xf32> to vector<8x128xf32>
    %80 = vector.extract_strided_slice %79 {offsets = [0, 0], sizes = [1, 128], strides = [1, 1]} : vector<8x128xf32> to vector<1x128xf32>
    %81 = vector.extract_strided_slice %71 {offsets = [31, 0], sizes = [1, 128], strides = [1, 1]} : vector<32x128xf32> to vector<1x128xf32>
    %82 = arith.subf %80, %81 : vector<1x128xf32>
    %83 = vector.broadcast %1 : f32 to vector<1x128xf32>
    %84 = arith.mulf %82, %83 : vector<1x128xf32>
    %85 = arith.mulf %74, %74 : vector<31x128xf32>
    %86 = vector.shape_cast %85 : vector<31x128xf32> to vector<1x31x128xf32>
    %cst_31 = arith.constant dense<0.000000e+00> : vector<1xf32>
    %87 = vector.multi_reduction <add>, %86, %cst_31 [1, 2] : vector<1x31x128xf32> to vector<1xf32>
    %88 = vector.shape_cast %87 : vector<1xf32> to vector<1x1x1xf32>
    %89 = vector.extract %88[0, 0, 0] : f32 from vector<1x1x1xf32>
    %90 = arith.mulf %77, %77 : vector<32x127xf32>
    %91 = vector.shape_cast %90 : vector<32x127xf32> to vector<1x32x127xf32>
    %cst_32 = arith.constant dense<0.000000e+00> : vector<1xf32>
    %92 = vector.multi_reduction <add>, %91, %cst_32 [1, 2] : vector<1x32x127xf32> to vector<1xf32>
    %93 = vector.shape_cast %92 : vector<1xf32> to vector<1x1x1xf32>
    %94 = vector.extract %93[0, 0, 0] : f32 from vector<1x1x1xf32>
    %95 = arith.addf %89, %94 : f32
    %96 = arith.mulf %84, %84 : vector<1x128xf32>
    %97 = vector.shape_cast %96 : vector<1x128xf32> to vector<1x1x128xf32>
    %cst_33 = arith.constant dense<0.000000e+00> : vector<1xf32>
    %98 = vector.multi_reduction <add>, %97, %cst_33 [1, 2] : vector<1x1x128xf32> to vector<1xf32>
    %99 = vector.shape_cast %98 : vector<1xf32> to vector<1x1x1xf32>
    %100 = vector.extract %99[0, 0, 0] : f32 from vector<1x1x1xf32>
    %101 = arith.addf %95, %100 : f32
    %cst_34 = arith.constant 0.0507264026 : f32
    %102 = arith.mulf %101, %cst_34 : f32
    %103 = arith.addf %69, %102 : f32
    %104 = vector.broadcast %103 : f32 to vector<1x8x128xf32>
    %c0_35 = arith.constant 0 : index
    %c0_36 = arith.constant 0 : index
    %c0_37 = arith.constant 0 : index
    %105 = vector.load %arg3[%c0_35, %c0_36, %c0_37] : memref<1x8x128xf32, #tpu.memory_space<vmem>>, vector<1x8x128xf32>
    tpu.vector_store %arg3[%c0_35, %c0_36, %c0_37], %104 {strides = array<i32>} : memref<1x8x128xf32, #tpu.memory_space<vmem>>, vector<1x8x128xf32>,
    return
  }
  func.func @transform_0(%arg0: i32) -> (i32, i32, i32, i32) {
    %c0_i32 = arith.constant 0 : i32
    %c0_i32_0 = arith.constant 0 : i32
    %c0_i32_1 = arith.constant 0 : i32
    %c0_i32_2 = arith.constant 0 : i32
    return %c0_i32, %c0_i32_0, %arg0, %c0_i32_1 : i32, i32, i32, i32
  }
  func.func @transform_1(%arg0: i32) -> (i32, i32, i32, i32) {
    %c1_i32 = arith.constant 1 : i32
    %0 = arith.addi %arg0, %c1_i32 : i32
    %c3_i32 = arith.constant 3 : i32
    %1 = arith.minsi %0, %c3_i32 : i32
    %c4_i32 = arith.constant 4 : i32
    %2 = arith.muli %1, %c4_i32 : i32
    %c0_i32 = arith.constant 0 : i32
    %c0_i32_0 = arith.constant 0 : i32
    %c0_i32_1 = arith.constant 0 : i32
    %c0_i32_2 = arith.constant 0 : i32
    return %c0_i32, %c0_i32_0, %2, %c0_i32_1 : i32, i32, i32, i32
  }
  func.func @transform_2(%arg0: i32) -> (i32, i32, i32) {
    %c0_i32 = arith.constant 0 : i32
    %c0_i32_0 = arith.constant 0 : i32
    %c0_i32_1 = arith.constant 0 : i32
    return %arg0, %c0_i32, %c0_i32_0 : i32, i32, i32
  }
}

</mosaic_0001>

<bundles_post_ra>
// kernel: _lambda_.1
= control target key start
LH: loop header
LB: loop body
LE: loop exit
PB: predicated region body
PF: predicated region fallthrough
CT: control target
= control target key end

     0   :  { %s1302_s0 = inlined_call_operand.hbm [shape: f32[1,3,128,128], index: 0, kind: input, shape index: {}, may-alias: {0,1}]   ;;  %s1303_s1 = inlined_call_operand.hbm [shape: f32[1,3,128,128], index: 1, kind: input, shape index: {}, may-alias: {0,1}]   ;;  %s1304_s2 = inlined_call_operand.vmem [shape: f32[4,8,128], index: 2, kind: output, shape index: {}]  }
   0x1   :  { %1306 = sst [smem:[#allocation12_spill]] %s1302_s0 }
   0x2   :  { %1307 = sst [smem:[#allocation13_spill]] %s1303_s1 }
   0x3   :  { %7 = vsyncpa [#allocation3], 0 }
   0x4   :  { %9 = vsyncpa [#allocation3 + $0x1], 0 }
   0x5   :  { %10 = vsyncpa [#allocation5], 0 }
   0x6   :  { %12 = vsyncpa [#allocation5 + $0x1], 0  ;;  %s965_s9 = smov 0   ;;  %s967_s10 = smov 0  }
   0x7   :  { %s969_s11 = smov 0   ;;  %s971_s12 = smov 0  }
   0x8   :  { %s973_s13 = smov 0   ;;  %s975_s14 = smov 0  }
   0x9   :  { %s977_s15 = smov 0  }
   0xa LB: > { %s999_s16 = sadd.s32 4294967295, %s936_s15   ;;  %s1002_s17 = sadd.s32 1, %s936_s15   ;;  %s936_s15 = sphi %s977_s15, %s1323_s15   ;;  %s932_s14 = sphi %s975_s14, %s1322_s14   ;;  %s928_s13 = sphi %s973_s13, %s1321_s13   ;;  %s924_s12 = sphi %s971_s12, %s1320_s12   ;;  %s920_s11 = sphi %s969_s11, %s1319_s11   ;;  %s916_s10 = sphi %s967_s10, %s1318_s10   ;;  %s912_s9 = sphi %s965_s9, %s1317_s9  }
   0xb   : > { %s22_s18 = ssub.s32 %s936_s15, %s1002_s17  ;;  %s25_s19 = sadd.s32 1, %s932_s14 }
   0xc   : > { %p23_p0 = scmp.eq.s32.totalorder %s22_s18, 0  ;;  %p32_p1 = scmp.ne.s32.totalorder %s932_s14, %s928_s13 }
   0xd   : > { %p33_p2 = scmp.eq.s32.totalorder %s936_s15, 0  ;;  %p38_p3 = scmp.ne.s32.totalorder %s928_s13, %s924_s12 }
   0xe   : > { %s1012_s20 = scalar_select %p23_p0, %s932_s14, %s25_s19  }
   0xf   : > { %p1016_p4 = por %p33_p2, %p32_p1  ;;  %p39_p5 = scmp.eq.s32.totalorder %s999_s16, 0 }
  0x10   : > { %1308 = sst [smem:[#allocation11_spill]] %s1012_s20  ;;  %p49_p6 = scmp.lt.s32.totalorder %s1002_s17, 3 }
  0x11   : > { %s52_s22 = sadd.s32 1, %s1002_s17  ;;  %p1025_p7 = por %p39_p5, %p38_p3 }
  0x12   : > { %p53_p8 = scmp.lt.s32.totalorder %s52_s22, 3  ;;  %s59_s26 = sadd.s32 1, %s920_s11 }
  0x13   : > { %s1030_s24 = scalar_select %p49_p6, %s1002_s17, 3 }
  0x14   : > { %s1325_s22 = smov (!%p53_p8, %s52_s22), 3  ;;  %p66_p9 = scmp.ne.s32.totalorder %s920_s11, %s916_s10 }
  0x15   : > { %s722_s25 = sshll.u32 %s1030_s24, 2  ;;  %s723_s27 = sshll.u32 %s1325_s22, 2 }
  0x16   : > { %s56_s28 = ssub.s32 %s722_s25, %s723_s27  ;;  %p72_p10 = scmp.ne.s32.totalorder %s916_s10, %s912_s9 }
  0x17   : > { %p57_p11 = scmp.eq.s32.totalorder %s56_s28, 0  ;;  %p1040_p12 = por %p66_p9, %p33_p2 }
  0x18   : > { %p1046_p13 = por %p72_p10, %p39_p5  ;;  %p725_p0 = scmp.ge.s32.totalorder %s936_s15, 4 }
  0x19   : > { %s1051_s3 = scalar_select %p57_p11, %s920_s11, %s59_s26  }
  0x1a   : > { %s1312_s30 = scalar_select %p1046_p13, 1, 0 }
  0x1b   : > { %118 = sbr.rel (%p725_p0) target bundleno = 77 (0x4d), region = 16 }
  0x20   : > { %s122_s4 = sand.u32 1, %s932_s14   ;;  %s746_s6 = sshll.u32 %s936_s15, 9 }
  0x21   : > { %s748_s5 = smul.u32 96, %s122_s4  ;;  %s938_s7 = smov 2048  }
  0x22   : > { %771 = sst [smem:[#allocation7]] (%p1016_p4), %s938_s7  ;;  %s939_s26 = smov 512  }
  0x23   : > { %s770_s8 = scalar_select %p1016_p4, [#allocation0], [#allocation8] }
  0x24   : > { %s1313_s0 = sld [smem:[#allocation12_spill]]  ;;  %s126_s22 = scalar_lea.vmem [#allocation2], %s748_s5 }
  0x25   : > { %s137_s19 = sld [smem:[%s770_s8]]   ;;  %s145_s25 = sshll.u32 %s126_s22, 4  ;;  %s146_s25 = int_to_ptr.vmem [resolvable:$true] %s145_s25 }
  0x26   : > { %772 = sst [smem:[#allocation7 + $0x1]] (%p1016_p4), %s939_s26  ;;  %s940_s27 = smov 4  }
  0x27   : > { %773 = sst [smem:[#allocation7 + $0x2]] (%p1016_p4), %s940_s27  ;;  %s941_s28 = smov 128  }
  0x28   : > { %774 = sst [smem:[#allocation7 + $0x3]] (%p1016_p4), %s941_s28  ;;  %s942_s7 = smov 8  }
  0x29   : > { %775 = sst [smem:[#allocation7 + $0x4]] (%p1016_p4), %s941_s28  ;;  %s123_s5 = scalar_lea.sflag [#allocation3], %s122_s4 }
  0x2a   : > { %s132_s18 = scalar_lea.hbm %s1313_s0, %s746_s6  ;;  %776 = sst [smem:[#allocation7 + $0x5]] (%p1016_p4), %s942_s7 }
  0x2b   : > { %s728_s6 = sshll.u32 %s137_s19, 26  ;;  %s943_s9 = smov 131072  }
  0x2c   : > { %s729_s8 = sadd.s32 134217728, %s728_s6  ;;  %s168_s12 = sand.u32 1, %s920_s11  }
  0x2d   : > { %777 = dma.general (%p1016_p4), %s132_s18, 1536, %s146_s25, %s123_s5, %s943_s9, [#allocation7], %s729_s8, 0  }
  0x2e   : > { %s747_s22 = sshll.u32 %s1030_s24, 9  ;;  %s749_s26 = smul.u32 24, %s168_s12 }
  0x2f   : > { %s1314_s1 = sld [smem:[#allocation13_spill]]  ;;  %s1084_s21 = scalar_lea.sflag [#allocation5], %s168_s12 }
  0x30   : > { %s172_s19 = scalar_lea.vmem [#allocation4], %s749_s26 }
  0x31   : > { %s182_s28 = sshll.u32 %s172_s19, 4  ;;  %s1082_s28 = int_to_ptr.vmem [resolvable:$true] %s182_s28 }
  0x35   : > { %s1080_s20 = scalar_lea.hbm %s1314_s1, %s747_s22  ;;  %s852_s0 = scalar_lea.hbm %s1314_s1, 6144 }
  0x36   : > { %s848_s4 = scalar_lea.hbm %s1080_s20, 384  ;;  %p853_p4 = scmp.lt.s32.totalorder %s1080_s20, %s1314_s1 }
  0x37   : > { %p849_p1 = scmp.ne.s32.totalorder %s1080_s20, %s848_s4  ;;  %p854_p5 = scmp.lt.s32.totalorder %s852_s0, %s848_s4 }
  0x39   : > { %p850_p2 = pnand %p849_p1, %p1040_p12  ;;  %p855_p6 = por %p854_p5, %p853_p4 }
  0x3b   : > { %p851_p3 = pneg %p850_p2 }
  0x3d   : > { %p856_p8 = pnand %p855_p6, %p851_p3 }
  0x3f   : > { %859 = shalt.err (!%p856_p8)
}
  0x40   : > { %s860_s6 = scalar_lea.vmem %s1082_s28, 384  ;;  %s944_s8 = smov [#allocation4]  }
  0x41   : > { %p861_p9 = scmp.ne.s32.totalorder %s1082_s28, %s860_s6  ;;  %s864_s5 = sshll.u32 %s944_s8, 4  ;;  %s865_s5 = int_to_ptr.vmem [resolvable:$false] %s864_s5 }
  0x42   : > { %s866_s9 = scalar_lea.vmem %s865_s5, 768  ;;  %p867_p0 = scmp.lt.s32.totalorder %s1082_s28, %s865_s5 }
  0x43   : > { %p862_p10 = pnand %p861_p9, %p1040_p12  ;;  %p868_p1 = scmp.lt.s32.totalorder %s866_s9, %s860_s6 }
  0x45   : > { %p863_p11 = pneg %p862_p10  ;;  %p869_p2 = por %p868_p1, %p867_p0 }
  0x47   : > { %p870_p13 = pnand %p869_p2, %p863_p11 }
  0x49   : > { %873 = shalt.err (!%p870_p13)
}
  0x4a   : > { %s945_s12 = smov 2048   ;;  %s946_s22 = smov 128  }
  0x4b   : > { %s947_s26 = smov 8  }
  0x4c   : > { %778 = dma.hbm_to_vmem [thread:$0]  (%p1040_p12), %s1080_s20, 384, %s1082_s28, %s1084_s21, %s945_s12, %s946_s22, %s947_s26  }
  0x4d PF: > { %p732_p3 = scmp.ge.s32.totalorder %s936_s15, 1  ;;  %p190_p4 = scmp.lt.s32.totalorder %s936_s15, 5 }
  0x4f   : > { %p191_p5 = pnand %p732_p3, %p190_p4 }
  0x50   : > { %s196_s27 = sand.u32 (!%p191_p5), 1, %s928_s13  }
  0x51   : > { %194 = sbr.rel (%p191_p5) target bundleno = 564 (0x234), region = 28  ;;  %s197_s4 = scalar_lea.sflag (!%p191_p5), [#allocation3], %s196_s27 }
  0x52   : > { %s750_s19 = smul.u32 (!%p191_p5), 96, %s196_s27 }
  0x54   : > { %s1110_s24 = scalar_lea.vmem (!%p191_p5), [#allocation2], %s750_s19 }
  0x56   : > { %903 = dma.done.wait (%p1025_p7), %s197_s4, 1536  }
  0x57   : > { %905 = vsyncadd (%p1025_p7), %s197_s4, 4294965760  ;;  %s205_s20 = sand.u32 1, %s916_s10   ;;  %p1315_p12 = scmp.ne.s32.totalorder %s1312_s30, 0 }
  0x58   : > { %s751_s29 = smul.u32 24, %s205_s20  ;;  %s206_s28 = scalar_lea.sflag [#allocation5], %s205_s20 }
  0x5a   : > { %s1117_s15 = scalar_lea.vmem [#allocation4], %s751_s29 }
  0x5b   : > { %907 = dma.done.wait (%p1315_p12), %s206_s28, 384  }
  0x5c   : > { %909 = vsyncadd (%p1315_p12), %s206_s28, 4294966912  ;;  %v1124_v0 = vld [vmem:[%s1110_s24] sm:$0xff]  ;;  %s948_s23 = smov 1   ;;  %v1132_v2 = vld [vmem:[%s1110_s24 + $0x8] sm:$0xff]  ;;  %s949_s30 = smov 127   ;;  %vm253_vm0 = vcmask 1040384  }
  0x5d   : > { %v1127_v1 = vld [vmem:[%s1110_s24 + $0x20] sm:$0xff]  ;;  %269 = vrot.lane.b32.xlu0 %v1124_v0, %s948_s23  ;;  %v1135_v3 = vld [vmem:[%s1110_s24 + $0x28] sm:$0xff]  ;;  %v1140_v4 = vld [vmem:[%s1110_s24 + $0x10] sm:$0xff]  ;;  %p239_p7 = scmp.lt.s32.totalorder %s999_s16, 3  ;;  %v254_v51 = vrot.slane %v1124_v0, 7  ;;  %v255_v52 = vrot.slane %v1132_v2, 7 }
  0x5e   : > { %399 = vrot.lane.b32.xlu1 %v1127_v1, %s948_s23  ;;  %v1143_v5 = vld [vmem:[%s1110_s24 + $0x30] sm:$0xff]  ;;  %v1148_v6 = vld [vmem:[%s1110_s24 + $0x40] sm:$0xff]  ;;  %v1151_v7 = vld [vmem:[%s1110_s24 + $0x48] sm:$0xff]  ;;  %v257_v53 = vrot.slane %v1140_v4, 7  ;;  %v384_v60 = vrot.slane %v1127_v1, 7  ;;  %v385_v61 = vrot.slane %v1135_v3, 7 }
  0x5f   : > { %v1156_v8 = vld [vmem:[%s1110_s24 + $0x18] sm:$0xff]  ;;  %v1164_v10 = vld [vmem:[%s1110_s24 + $0x50] sm:$0xff]  ;;  %s244_s21 = scalar_select %p239_p7, 1.0, 0.0  ;;  %v256_v56 = vsel %vm253_vm0, %v254_v51, %v255_v52  ;;  %v265_v59 = vsub.f32 %v1124_v0, %v254_v51  ;;  %vm298_vm1 = vcmask 1046528   ;;  %vm343_vm2 = vcmask 1039360  }
  0x60   : > { %v1159_v9 = vld [vmem:[%s1110_s24 + $0x38] sm:$0xff]  ;;  %v743_v30 = vld [vmem:[%s1117_s15 + $0x10] sm:$0xff]  ;;  %v258_v57 = vsel %vm253_vm0, %v255_v52, %v257_v53  ;;  %v259_v58 = vrot.slane %v1156_v8, 7  ;;  %v266_v62 = vsub.f32 %v1132_v2, %v256_v56  ;;  %s1327_s16 = smov (!%p239_p7, %s999_s16), 3 }
  0x61   : > { %271 = vrot.lane.b32.xlu0 %v1132_v2, %s948_s23  ;;  %v1167_v11 = vld [vmem:[%s1110_s24 + $0x58] sm:$0xff]  ;;  %v1191_v37 = vstv %s244_s21  ;;  %v267_v63 = vsub.f32 %v1140_v4, %v258_v57  ;;  %s733_s28 = sshll.u32 %s1327_s16, 3 }
  0x62   : > { %401 = vrot.lane.b32.xlu1 %v1135_v3, %s948_s23  ;;  %v517_v28 = vrot.slane %v1167_v11, 7  ;;  %s242_s1 = scalar_lea.vmem %s1304_s2, %s733_s28 }
  0x64   : > { %v546_v33 = vsub.f32 %v743_v30, %v517_v28 }
  0x65   : > { %273 = vrot.lane.b32.xlu0 %v1140_v4, %s948_s23 }
  0x66   : > { %403 = vrot.lane.b32.xlu1 %v1143_v5, %s948_s23  ;;  %v1194_v38 = vmul.f32 %v546_v33, %v1191_v37 }
  0x69   : > { %527 = vrot.lane.b32.xlu0 %v1148_v6, %s948_s23 }
  0x6a   : > { %529 = vrot.lane.b32.xlu1 %v1151_v7, %s948_s23 }
  0x6d   : > { %275 = vrot.lane.b32.xlu0 %v1156_v8, %s948_s23 }
  0x6e   : > { %405 = vrot.lane.b32.xlu1 %v1159_v9, %s948_s23 }
  0x71   : > { %531 = vrot.lane.b32.xlu0 %v1164_v10, %s948_s23 }
  0x72   : > { %533 = vrot.lane.b32.xlu1 %v1167_v11, %s948_s23 }
  0xcf   : > { %v270_v12 = vpop.permute.xlu0 %269 }
  0xd0   : > { %v400_v13 = vpop.permute.xlu1 %399  ;;  %v281_v14 = vsub.f32 %v1124_v0, %v270_v12  ;;  %v387_v12 = vrot.slane %v1143_v5, 7  ;;  %v515_v0 = vrot.slane %v1164_v10, 7 }
  0xd1   : > { %v411_v15 = vsub.f32 %v1127_v1, %v400_v13  ;;  %v260_v13 = vsel %vm253_vm0, %v257_v53, %v259_v58 }
  0xd2   : > { %v323_v16 = vmul.f32 %v281_v14, %v281_v14  ;;  %v512_v14 = vrot.slane %v1148_v6, 7 }
  0xd3   : > { %v272_v17 = vpop.permute.xlu0 %271  ;;  %v452_v19 = vmul.f32 %v411_v15, %v411_v15  ;;  %v513_v15 = vrot.slane %v1151_v7, 7 }
  0xd4   : > { %v402_v18 = vpop.permute.xlu1 %401  ;;  %v282_v20 = vsub.f32 %v1132_v2, %v272_v17  ;;  %331 = vrot.lane.b32.xlu0 %v323_v16, %s949_s30  ;;  %v290_v16 = vmul.f32 %v265_v59, %v265_v59  ;;  %v386_v17 = vsel %vm253_vm0, %v384_v60, %v385_v61  ;;  %v388_v2 = vsel %vm253_vm0, %v385_v61, %v387_v12 }
  0xd5   : > { %v412_v21 = vsub.f32 %v1135_v3, %v402_v18  ;;  %v291_v18 = vmul.f32 %v266_v62, %v266_v62 }
  0xd6   : > { %v324_v22 = vmul.f32 %v282_v20, %v282_v20  ;;  %v389_v20 = vrot.slane %v1159_v9, 7 }
  0xd7   : > { %v274_v23 = vpop.permute.xlu0 %273  ;;  %v453_v25 = vmul.f32 %v412_v21, %v412_v21  ;;  %v514_v21 = vsel %vm253_vm0, %v512_v14, %v513_v15 }
  0xd8   : > { %v404_v24 = vpop.permute.xlu1 %403  ;;  %v283_v26 = vsub.f32 %v1140_v4, %v274_v23  ;;  %460 = vrot.lane.b32.xlu0 %v452_v19, %s949_s30  ;;  %333 = vrot.lane.b32.xlu1 %v324_v22, %s949_s30  ;;  %v292_v19 = vmul.f32 %v267_v63, %v267_v63  ;;  %v268_v4 = vsub.f32 %v1156_v8, %v260_v13 }
  0xd9   : > { %v413_v27 = vsub.f32 %v1143_v5, %v404_v24  ;;  %v516_v22 = vsel %vm253_vm0, %v513_v15, %v515_v0  ;;  %v395_v23 = vsub.f32 %v1127_v1, %v384_v60  ;;  %v396_v24 = vsub.f32 %v1135_v3, %v386_v17  ;;  %v738_v60 = vld [vmem:[%s1117_s15 + $0x8] sm:$0xff] }
  0xda   : > { %v325_v29 = vmul.f32 %v283_v26, %v283_v26  ;;  %v523_v26 = vsub.f32 %v1148_v6, %v512_v14  ;;  %v302_v30 = vrot.slane %v292_v19, 1  ;;  %v390_v33 = vsel %vm253_vm0, %v387_v12, %v389_v20 }
  0xdb   : > { %v528_v31 = vpop.permute.xlu0 %527  ;;  %v454_v34 = vmul.f32 %v413_v27, %v413_v27  ;;  %v299_v27 = vrot.slane %v290_v16, 1  ;;  %v518_v1 = vsel %vm253_vm0, %v515_v0, %v517_v28  ;;  %v420_v3 = vmul.f32 %v395_v23, %v395_v23 }
  0xdc   : > { %v530_v32 = vpop.permute.xlu1 %529  ;;  %v539_v35 = vsub.f32 %v1148_v6, %v528_v31  ;;  %462 = vrot.lane.b32.xlu1 %v453_v25, %s949_s30  ;;  %335 = vrot.lane.b32.xlu0 %v325_v29, %s949_s30  ;;  %v397_v25 = vsub.f32 %v1143_v5, %v388_v2  ;;  %v300_v29 = vrot.slane %v291_v18, 1  ;;  %v293_v31 = vmul.f32 %v268_v4, %v268_v4 }
  0xdd   : > { %v540_v36 = vsub.f32 %v1151_v7, %v530_v32  ;;  %v525_v32 = vsub.f32 %v1164_v10, %v516_v22  ;;  %v421_v5 = vmul.f32 %v396_v24, %v396_v24  ;;  %v418_v14 = vsub.f32 %v738_v60, %v389_v20 }
  0xde   : > { %v580_v39 = vmul.f32 %v539_v35, %v539_v35  ;;  %v301_v6 = vsel %vm298_vm1, %v299_v27, %v300_v29  ;;  %v303_v35 = vsel %vm298_vm1, %v300_v29, %v302_v30 }
  0xdf   : > { %v276_v40 = vpop.permute.xlu0 %275  ;;  %v581_v42 = vmul.f32 %v540_v36, %v540_v36  ;;  %v304_v36 = vrot.slane %v293_v31, 1  ;;  %v419_v19 = vmul.f32 %v418_v14, %v1191_v37 }
  0xe0   : > { %v406_v41 = vpop.permute.xlu1 %405  ;;  %v284_v43 = vsub.f32 %v1156_v8, %v276_v40  ;;  %464 = vrot.lane.b32.xlu1 %v454_v34, %s949_s30  ;;  %588 = vrot.lane.b32.xlu0 %v580_v39, %s949_s30  ;;  %v524_v8 = vsub.f32 %v1151_v7, %v514_v21  ;;  %v422_v34 = vmul.f32 %v397_v25, %v397_v25 }
  0xe1   : > { %v414_v44 = vsub.f32 %v1159_v9, %v406_v41  ;;  %v398_v39 = vsub.f32 %v1159_v9, %v390_v33  ;;  %v548_v7 = vmul.f32 %v523_v26, %v523_v26  ;;  %v285_v41 = vld [vmem:[%s1117_s15] sm:$0xff]  ;;  %v312_v53 = vsel %vm298_vm1, %v304_v36, 0.0 }
  0xe2   : > { %v326_v45 = vmul.f32 %v284_v43, %v284_v43  ;;  %v549_v40 = vmul.f32 %v524_v8, %v524_v8  ;;  %v428_v43 = vrot.slane %v420_v3, 1  ;;  %v431_v28 = vrot.slane %v422_v34, 1 }
  0xe3   : > { %v532_v46 = vpop.permute.xlu0 %531  ;;  %v455_v48 = vmul.f32 %v414_v44, %v414_v44  ;;  %v429_v44 = vrot.slane %v421_v5, 1  ;;  %v489_v22 = vmul.f32 %v419_v19, %v419_v19 }
  0xe4   : > { %v534_v47 = vpop.permute.xlu1 %533  ;;  %v541_v49 = vsub.f32 %v1164_v10, %v532_v46  ;;  %590 = vrot.lane.b32.xlu1 %v581_v42, %s949_s30  ;;  %337 = vrot.lane.b32.xlu0 %v326_v45, %s949_s30  ;;  %v550_v10 = vmul.f32 %v525_v32, %v525_v32  ;;  %v526_v42 = vsub.f32 %v1167_v11, %v518_v1 }
  0xe5   : > { %v542_v50 = vsub.f32 %v1167_v11, %v534_v47  ;;  %v310_v45 = vadd.f32 %v303_v35, %v301_v6  ;;  %v305_v46 = vsel %vm298_vm1, %v302_v30, %v304_v36  ;;  %v287_v47 = vsub.f32 %v285_v41, %v259_v58 }
  0xe6   : > { %v582_v54 = vmul.f32 %v541_v49, %v541_v49  ;;  %v556_v49 = vrot.slane %v548_v7, 1  ;;  %v559_v51 = vrot.slane %v550_v10, 1  ;;  %v551_v52 = vmul.f32 %v526_v42, %v526_v42 }
  0xe7   : > { %v583_v55 = vmul.f32 %v542_v50, %v542_v50  ;;  %v557_v50 = vrot.slane %v549_v40, 1  ;;  %v311_v9 = vadd.f32 %v310_v45, %v305_v46  ;;  %v430_v11 = vsel %vm298_vm1, %v428_v43, %v429_v44 }
  0xe8   : > { %466 = vrot.lane.b32.xlu1 %v455_v48, %s949_s30  ;;  %592 = vrot.lane.b32.xlu0 %v582_v54, %s949_s30  ;;  %v423_v48 = vmul.f32 %v398_v39, %v398_v39  ;;  %v289_v54 = vmul.f32 %v1191_v37, %v287_v47  ;;  %v561_v58 = vrot.slane %v551_v52, 1  ;;  %v490_v20 = vsel %vm253_vm0, %v489_v22, 0.0 }
  0xe9   : > { %v558_v57 = vsel %vm298_vm1, %v556_v49, %v557_v50  ;;  %v560_v59 = vsel %vm298_vm1, %v557_v50, %v559_v51  ;;  %v313_v61 = vadd.f32 %v312_v53, %v311_v9  ;;  %v617_v45 = vmul.f32 %v1194_v38, %v1194_v38 }
  0xea   : > { %v433_v56 = vrot.slane %v423_v48, 1  ;;  %v361_v63 = vmul.f32 %v289_v54, %v289_v54  ;;  %v567_v12 = vadd.f32 %v560_v59, %v558_v57  ;;  %v562_v15 = vsel %vm298_vm1, %v559_v51, %v561_v58 }
  0xeb   : > { %v569_v2 = vsel %vm298_vm1, %v561_v58, 0.0  ;;  %v618_v50 = vsel %vm253_vm0, %v617_v45, 0.0 }
  0xec   : > { %594 = vrot.lane.b32.xlu1 %v583_v55, %s949_s30  ;;  %v432_v55 = vsel %vm298_vm1, %v429_v44, %v431_v28  ;;  %v434_v13 = vsel %vm298_vm1, %v431_v28, %v433_v56  ;;  %v362_v16 = vsel %vm253_vm0, %v361_v63, 0.0  ;;  %v568_v17 = vadd.f32 %v567_v12, %v562_v15 }
  0xed   : > { %v439_v62 = vadd.f32 %v432_v55, %v430_v11  ;;  %v441_v18 = vsel %vm298_vm1, %v433_v56, 0.0 }
  0xee   : > { %v570_v21 = vadd.f32 %v569_v2, %v568_v17 }
  0xef   : > { %v440_v0 = vadd.f32 %v439_v62, %v434_v13 }
  0xf1   : > { %v442_v4 = vadd.f32 %v441_v18, %v440_v0 }
 0x107   : > { %314 = vadd.xlane.f32.xlu0 %v313_v61 }
 0x10b   : > { %363 = vadd.xlane.f32.xlu0 %v362_v16 }
 0x10f   : > { %443 = vadd.xlane.f32.xlu0 %v442_v4 }
 0x110   : > { %571 = vadd.xlane.f32.xlu1 %v570_v21 }
 0x113   : > { %491 = vadd.xlane.f32.xlu0 %v490_v20 }
 0x146   : > { %v332_v23 = vpop.permute.xlu0 %331 }
 0x147   : > { %v344_v31 = vsel %vm343_vm2, %v332_v23, 0.0 }
 0x14a   : > { %v334_v24 = vpop.permute.xlu1 %333  ;;  %v461_v25 = vpop.permute.xlu0 %460 }
 0x14b   : > { %v345_v29 = vsel %vm343_vm2, %v334_v24, 0.0  ;;  %v472_v34 = vsel %vm343_vm2, %v461_v25, 0.0 }
 0x14c   : > { %v346_v32 = vadd.f32 %v345_v29, %v344_v31 }
 0x14e   : > { %v463_v26 = vpop.permute.xlu1 %462  ;;  %v336_v27 = vpop.permute.xlu0 %335 }
 0x14f   : > { %v347_v8 = vsel %vm343_vm2, %v336_v27, 0.0  ;;  %v473_v33 = vsel %vm343_vm2, %v463_v26, 0.0 }
 0x150   : > { %v348_v1 = vadd.f32 %v347_v8, %v346_v32  ;;  %v474_v36 = vadd.f32 %v473_v33, %v472_v34 }
 0x152   : > { %v465_v37 = vpop.permute.xlu1 %464  ;;  %v589_v30 = vpop.permute.xlu0 %588 }
 0x153   : > { %v475_v6 = vsel %vm343_vm2, %v465_v37, 0.0  ;;  %v600_v42 = vsel %vm343_vm2, %v589_v30, 0.0 }
 0x154   : > { %v476_v40 = vadd.f32 %v475_v6, %v474_v36 }
 0x156   : > { %v591_v3 = vpop.permute.xlu1 %590  ;;  %v338_v5 = vpop.permute.xlu0 %337 }
 0x157   : > { %v349_v35 = vsel %vm343_vm2, %v338_v5, 0.0  ;;  %v601_v7 = vsel %vm343_vm2, %v591_v3, 0.0 }
 0x158   : > { %v350_v39 = vadd.f32 %v349_v35, %v348_v1  ;;  %v602_v28 = vadd.f32 %v601_v7, %v600_v42 }
 0x15a   : > { %v467_v10 = vpop.permute.xlu1 %466  ;;  %351 = vadd.xlane.f32.xlu1 %v350_v39  ;;  %v593_v41 = vpop.permute.xlu0 %592 }
 0x15b   : > { %v477_v43 = vsel %vm343_vm2, %v467_v10, 0.0  ;;  %v603_v44 = vsel %vm343_vm2, %v593_v41, 0.0 }
 0x15c   : > { %v478_v46 = vadd.f32 %v477_v43, %v476_v40  ;;  %v604_v47 = vadd.f32 %v603_v44, %v602_v28 }
 0x15e   : > { %v595_v48 = vpop.permute.xlu1 %594  ;;  %479 = vadd.xlane.f32.xlu1 %v478_v46 }
 0x15f   : > { %v605_v49 = vsel %vm343_vm2, %v595_v48, 0.0 }
 0x160   : > { %v606_v51 = vadd.f32 %v605_v49, %v604_v47 }
 0x162   : > { %619 = vadd.xlane.f32.xlu1 %v618_v50  ;;  %607 = vadd.xlane.f32.xlu0 %v606_v51 }
 0x190   : > { %v315_v52 = vpop.xlane.xlu0 %314 }
 0x191   : > { %v316_v9 = vrot.slane %v315_v52, 4 }
 0x193   : > { %v317_v53 = vadd.f32 %v316_v9, %v315_v52 }
 0x194   : > { %v364_v38 = vpop.xlane.xlu0 %363 }
 0x195   : > { %v318_v54 = vrot.slane %v317_v53, 2  ;;  %v365_v59 = vrot.slane %v364_v38, 4 }
 0x197   : > { %v319_v11 = vadd.f32 %v318_v54, %v317_v53  ;;  %v366_v62 = vadd.f32 %v365_v59, %v364_v38 }
 0x198   : > { %v444_v57 = vpop.xlane.xlu0 %443 }
 0x199   : > { %v320_v55 = vrot.slane %v319_v11, 1  ;;  %v445_v58 = vrot.slane %v444_v57, 4  ;;  %v572_v60 = vpop.xlane.xlu1 %571  ;;  %v367_v14 = vrot.slane %v366_v62, 2 }
 0x19a   : > { %v573_v63 = vrot.slane %v572_v60, 4 }
 0x19b   : > { %v321_v56 = vadd.f32 %v320_v55, %v319_v11  ;;  %v446_v12 = vadd.f32 %v445_v58, %v444_v57  ;;  %v368_v22 = vadd.f32 %v367_v14, %v366_v62 }
 0x19c   : > { %v492_v61 = vpop.xlane.xlu0 %491  ;;  %v574_v15 = vadd.f32 %v573_v63, %v572_v60 }
 0x19d   : > { %752 = vpush %v321_v56  ;;  %v493_v13 = vrot.slane %v492_v61, 4  ;;  %v447_v0 = vrot.slane %v446_v12, 2  ;;  %v369_v37 = vrot.slane %v368_v22, 1 }
 0x19e   : > { %v575_v2 = vrot.slane %v574_v15, 2 }
 0x19f   : > { %v494_v16 = vadd.f32 %v493_v13, %v492_v61  ;;  %v448_v20 = vadd.f32 %v447_v0, %v446_v12  ;;  %v370_v36 = vadd.f32 %v369_v37, %v368_v22 }
 0x1a0   : > { %v576_v8 = vadd.f32 %v575_v2, %v574_v15 }
 0x1a1   : > { %v495_v4 = vrot.slane %v494_v16, 2  ;;  %v449_v30 = vrot.slane %v448_v20, 1 }
 0x1a2   : > { %v577_v7 = vrot.slane %v576_v8, 1 }
 0x1a3   : > { %v496_v31 = vadd.f32 %v495_v4, %v494_v16  ;;  %v450_v41 = vadd.f32 %v449_v30, %v448_v20 }
 0x1a4   : > { %v578_v46 = vadd.f32 %v577_v7, %v576_v8 }
 0x1a5   : > { %v497_v39 = vrot.slane %v496_v31, 1 }
 0x1a7   : > { %v498_v28 = vadd.f32 %v497_v39, %v496_v31 }
 0x1ce   : > { %s753_s18 = spop %752 }
 0x1e3   : > { %v352_v17 = vpop.xlane.xlu1 %351 }
 0x1e4   : > { %v353_v18 = vrot.slane %v352_v17, 4 }
 0x1e6   : > { %v354_v19 = vadd.f32 %v353_v18, %v352_v17 }
 0x1e7   : > { %v480_v21 = vpop.xlane.xlu1 %479 }
 0x1e8   : > { %v355_v23 = vrot.slane %v354_v19, 2  ;;  %v481_v24 = vrot.slane %v480_v21, 4 }
 0x1ea   : > { %v482_v25 = vadd.f32 %v481_v24, %v480_v21  ;;  %v356_v26 = vadd.f32 %v355_v23, %v354_v19 }
 0x1eb   : > { %v620_v27 = vpop.xlane.xlu1 %619  ;;  %v608_v29 = vpop.xlane.xlu0 %607 }
 0x1ec   : > { %v483_v32 = vrot.slane %v482_v25, 2  ;;  %v621_v33 = vrot.slane %v620_v27, 4  ;;  %v609_v1 = vrot.slane %v608_v29, 4  ;;  %v357_v3 = vrot.slane %v356_v26, 1 }
 0x1ee   : > { %v622_v5 = vadd.f32 %v621_v33, %v620_v27  ;;  %v610_v34 = vadd.f32 %v609_v1, %v608_v29  ;;  %v358_v6 = vadd.f32 %v357_v3, %v356_v26  ;;  %v484_v35 = vadd.f32 %v483_v32, %v482_v25 }
 0x1f0   : > { %v623_v40 = vrot.slane %v622_v5, 2  ;;  %v611_v10 = vrot.slane %v610_v34, 2  ;;  %754 = vpush %v358_v6  ;;  %v485_v42 = vrot.slane %v484_v35, 1 }
 0x1f1   : > { %756 = vpush %v370_v36 }
 0x1f2   : > { %v624_v43 = vadd.f32 %v623_v40, %v622_v5  ;;  %v612_v44 = vadd.f32 %v611_v10, %v610_v34  ;;  %758 = vpush %v450_v41  ;;  %v486_v45 = vadd.f32 %v485_v42, %v484_v35 }
 0x1f4   : > { %760 = vpush %v486_v45  ;;  %v613_v47 = vrot.slane %v612_v44, 1  ;;  %v625_v48 = vrot.slane %v624_v43, 1 }
 0x1f5   : > { %762 = vpush %v498_v28 }
 0x1f6   : > { %764 = vpush %v578_v46  ;;  %v614_v49 = vadd.f32 %v613_v47, %v612_v44  ;;  %v626_v50 = vadd.f32 %v625_v48, %v624_v43 }
 0x1f8   : > { %766 = vpush %v614_v49 }
 0x1f9   : > { %768 = vpush %v626_v50 }
 0x221   : > { %s755_s0 = spop %754 }
 0x222   : > { %s757_s25 = spop %756  ;;  %s360_s6 = sadd.f32 %s755_s0, %s753_s18 }
 0x223   : > { %s759_s7 = spop %758 }
 0x224   : > { %s372_s26 = sadd.f32 %s757_s25, %s360_s6 }
 0x225   : > { %s761_s8 = spop %760 }
 0x226   : > { %s488_s5 = sadd.f32 %s761_s8, %s759_s7  ;;  %s763_s9 = spop %762 }
 0x227   : > { %s765_s22 = spop %764  ;;  %s373_s20 = smul.f32 0.05236452, %s372_s26 }
 0x228   : > { %s500_s12 = sadd.f32 %s763_s9, %s488_s5 }
 0x229   : > { %s767_s27 = spop %766 }
 0x22a   : > { %s616_s19 = sadd.f32 %s767_s27, %s765_s22  ;;  %s501_s4 = smul.f32 0.050272476, %s500_s12 }
 0x22b   : > { %s769_s24 = spop %768 }
 0x22c   : > { %s628_s29 = sadd.f32 %s769_s24, %s616_s19 }
 0x22d   : > { %s502_s15 = sadd.f32 %s501_s4, %s373_s20 }
 0x22e   : > { %s629_s23 = smul.f32 0.050726403, %s628_s29 }
 0x230   : > { %s630_s18 = sadd.f32 %s629_s23, %s502_s15 }
 0x232   : > { %v631_v51 = vstv %s630_s18 }
 0x233   : > { %632 = vst [vmem:[%s242_s1] sm:$0xff] %v631_v51 }
 0x234 PF: > { %s1316_s0 = sld [smem:[#allocation11_spill]]  ;;  %p15_p13 = scmp.ge.s32.totalorder %s1002_s17, 6  }
 0x235   : > { %s1317_s9 = smov %s916_s10  ;;  %s1318_s10 = smov %s920_s11 }
 0x236   : > { %s1319_s11 = smov %s1051_s3  ;;  %s1320_s12 = smov %s928_s13 }
 0x237   : > { %s1321_s13 = smov %s932_s14  ;;  %s1323_s15 = smov %s1002_s17 }
 0x238   :  { %17 = sbr.rel (!%p15_p13) target bundleno = 10 (0xa), region = 90 }
 0x23a   : > { %s1322_s14 = smov %s1316_s0 }
 0x23d   :  { %652 = vsyncpa [#allocation3], 1 }
 0x23e   :  { %654 = vsyncpa [#allocation3 + $0x1], 1 }
 0x23f   :  { %655 = vsyncpa [#allocation5], 1 }
 0x240   :  { %657 = vsyncpa [#allocation5 + $0x1], 1 }

</bundles_post_ra>
